<compile_context>
chip_gen: v5e
topology: v5e:2x2
jax: 0.10.0
libtpu: 0.0.40
codegen_flags: <defaults>
</compile_context>

<pallas_src>
import jax
import jax.numpy as jnp
from jax.experimental import pallas as pl
from jax.experimental.pallas import tpu as pltpu


def _make_kernel(valid_s):
    """Build the fused kernel; `valid_s` is the un-padded sequence length."""

    def kernel(x_ref, w1_ref, w2_ref, out_v_ref, out_w_ref):
        # x_ref:     (Bt, Sp, D)  batch tile (Sp = S padded to a multiple of 8)
        # w1_ref:    (D, Hp)      key_hidden.weight^T, zero-padded to Hp lanes
        # w2_ref:    (1, Hp)      key_output.weight (f32), zero-padded / one-hot
        # out_v_ref: (Bt, D)      weighted values (input dtype)
        # out_w_ref: (Bt, Sp)     attention weights (f32)
        Bt, Sp, D = x_ref.shape
        Hp = w1_ref.shape[1]

        x = x_ref[...]                                            # (Bt, Sp, D)

        # MXU matmul in the storage dtype (bf16 inputs -> native rate), f32 acc.
        x_mxu = x if x.dtype == w1_ref.dtype else x.astype(w1_ref.dtype)
        # Sp % 8 == 0, so merging (Bt, Sp) is a free view (no sublane relayout).
        keys = jnp.dot(x_mxu.reshape(Bt * Sp, D), w1_ref[...],
                       preferred_element_type=jnp.float32)        # (Bt*Sp, Hp)
        keys = jnp.maximum(keys, 0.0)                             # ReLU

        # Second linear has N == 1: VPU multiply + XLU lane reduce (free slots)
        # instead of an MXU matmul with a single output column.
        scores = jnp.sum(keys.reshape(Bt, Sp, Hp) * w2_ref[...],
                         axis=-1)                                 # (Bt, Sp)

        if valid_s != Sp:  # static condition: mask padded sequence positions
            pos = jax.lax.broadcasted_iota(jnp.int32, (Bt, Sp), 1)
            scores = jnp.where(pos < valid_s, scores, -1e30)

        # Numerically stable softmax over the sequence (lane) axis, all in f32.
        m = jnp.max(scores, axis=-1, keepdims=True)               # (Bt, 1)
        e = jnp.exp(scores - m)                                   # (Bt, Sp)
        denom = jnp.sum(e, axis=-1, keepdims=True)                # (Bt, 1)
        inv = pl.reciprocal(denom, approx=True)                   # EUP slot
        inv = inv * (2.0 - denom * inv)                           # Newton -> ~f32
        attn = e * inv                                            # (Bt, Sp)

        out_w_ref[...] = attn.astype(out_w_ref.dtype)             # f32 out

        # Weighted sum over S: VPU broadcast multiply + XLU sublane reduce, f32.
        wv = jnp.sum(attn[:, :, None] * x.astype(jnp.float32), axis=1)  # (Bt,D)
        out_v_ref[...] = wv.astype(out_v_ref.dtype)

    return kernel


def _vmem_working_set(bt, sp, d, hp, x_itemsize, w_itemsize, out_itemsize):
    """Conservative per-grid-step VMEM estimate: pipeline buffers PLUS the
    in-kernel temporaries (keys, f32 casts, weighted-sum product)."""
    toks = bt * sp
    pipeline = (2 * toks * d * x_itemsize            # x tile (double-buffered)
                + (d * hp * w_itemsize + hp * 4)     # resident weights (single)
                + 2 * bt * d * out_itemsize          # weighted-values output
                + 2 * bt * sp * 4)                   # attention output (f32)
    interm = (toks * d * w_itemsize                  # MXU-dtype copy of x
              + toks * d * 4                         # f32 copy of x
              + toks * d * 4                         # attn * x product
              + 2 * toks * hp * 4                    # keys + keys*w2 product
              + 4 * bt * sp * 4                      # scores / exp / attn / mask
              + bt * d * 4)                          # wv
    return int(pipeline + interm)


def _pick_batch_tile(B, Sp, D, Hp, x_itemsize, w_itemsize, out_itemsize,
                     budget_bytes):
    """Largest sublane-aligned batch tile whose real working set fits the
    budget; prefers an even number of >=2 grid steps (v7x dual TensorCore)."""
    def ws(bt):
        return _vmem_working_set(bt, Sp, D, Hp, x_itemsize, w_itemsize,
                                 out_itemsize)

    if B <= 8:
        # Whole batch in one block (block == full array dim is always legal).
        # TODO(synk): add a sequence-tiled (two-pass / online softmax) path for
        # very long S where even the whole-batch tile overflows VMEM.
        return B, ws(B)

    B8 = ((B + 7) // 8) * 8
    cap = max(8, (B8 // 2) // 8 * 8)                  # keep >= 2 grid steps
    fits = [bt for bt in range(8, cap + 1, 8) if ws(bt) <= budget_bytes] or [8]
    best = max(fits)
    even = [bt for bt in fits if (-(-B // bt)) % 2 == 0]
    if even and 2 * max(even) >= best:                # don't halve the tile
        best = max(even)
    return best, ws(best)


def self_attentive_sum(input_embed, w_key_hidden, w_key_output, hidden_dim,
                       mxu_dtype=None):
    """input_embed:  (B, S, D) float
       w_key_hidden: (H, D)  (PyTorch nn.Linear weight layout, no bias)
       w_key_output: (1, H)
    Returns (weighted_values (B, D) in input dtype,
             weighted_keys   (B, S, 1) in float32)."""
    B, S, D = input_embed.shape
    H = hidden_dim
    x_dtype = input_embed.dtype
    # MXU operand dtype: defaults to the storage dtype (bf16 inputs -> native
    # MXU rate + halved HBM traffic; f32 inputs keep full precision).  Callers
    # may force jnp.bfloat16 when reduced matmul precision is acceptable.
    mxu_dtype = jnp.dtype(x_dtype if mxu_dtype is None else mxu_dtype)

    # Pad the hidden dim to a lane multiple; exact because the extra W1 columns
    # are zero (ReLU(0) = 0) and the extra W2 entries are zero.
    Hp = ((H + 127) // 128) * 128
    w1 = jnp.zeros((D, Hp), dtype=mxu_dtype).at[:, :H].set(
        jnp.transpose(w_key_hidden).astype(mxu_dtype))
    if hidden_dim == 1:
        # PyTorch skips key_output when hidden_dim == 1; a one-hot W2 row makes
        # the score equal to the single ReLU key, so one kernel covers both.
        w2 = jnp.zeros((1, Hp), dtype=jnp.float32).at[0, 0].set(1.0)
    else:
        w2 = jnp.zeros((1, Hp), dtype=jnp.float32).at[:, :H].set(
            w_key_output.astype(jnp.float32))

    # Pad S to a sublane multiple so the in-kernel reshapes around the matmul
    # are free views; padded positions are masked to -inf before the softmax.
    Sp = ((S + 7) // 8) * 8
    x = input_embed
    if Sp != S:
        x = jnp.pad(x, ((0, 0), (0, Sp - S), (0, 0)))

    # Generation-aware VMEM budget (v7x: 64 MiB per TensorCore; v5e/v6e: 128).
    try:
        vmem_cap = int(getattr(pltpu.get_tpu_info(), "vmem_capacity_bytes",
                               64 << 20))
    except Exception:
        vmem_cap = 64 << 20
    budget = (vmem_cap * 3) // 8

    x_is = jnp.dtype(x_dtype).itemsize
    w_is = mxu_dtype.itemsize
    out_is = x_is
    Bt, ws = _pick_batch_tile(B, Sp, D, Hp, x_is, w_is, out_is, budget)

    n_tiles = -(-B // Bt)
    B_pad = n_tiles * Bt
    if B_pad != B:
        # Zero rows softmax to a uniform distribution and are sliced off below;
        # they never contaminate real rows (softmax is per-row).
        x = jnp.pad(x, ((0, B_pad - B), (0, 0), (0, 0)))

    # Scoped-VMEM limit sized to the real working set + headroom (never below
    # the 32 MiB default of v6e/v7x, never above 3/4 of physical capacity).
    vmem_limit = int(max(32 << 20, min((vmem_cap * 3) // 4, ws + (16 << 20))))

    kernel = _make_kernel(S)

    def build(resident_kwargs):
        return pl.pallas_call(
            kernel,
            out_shape=(
                jax.ShapeDtypeStruct((B_pad, D), x_dtype),
                jax.ShapeDtypeStruct((B_pad, Sp), jnp.float32),
            ),
            grid_spec=pltpu.PrefetchScalarGridSpec(
                num_scalar_prefetch=0,
                grid=(n_tiles,),
                in_specs=[
                    pl.BlockSpec((Bt, Sp, D), lambda b: (b, 0, 0)),   # x tile
                    pl.BlockSpec((D, Hp), lambda b: (0, 0),
                                 **resident_kwargs),                  # W1
                    pl.BlockSpec((1, Hp), lambda b: (0, 0),
                                 **resident_kwargs),                  # W2
                ],
                out_specs=[
                    pl.BlockSpec((Bt, D), lambda b: (b, 0)),    # weighted values
                    pl.BlockSpec((Bt, Sp), lambda b: (b, 0)),   # attention (f32)
                ],
            ),
            compiler_params=pltpu.CompilerParams(
                dimension_semantics=("parallel",),
                vmem_limit_bytes=vmem_limit,
            ),
            cost_estimate=pl.CostEstimate(
                flops=2 * B_pad * Sp * D * Hp + 2 * B_pad * Sp * (Hp + D),
                transcendentals=B_pad * Sp,
                bytes_accessed=(B_pad * Sp * D * x_is + D * Hp * w_is + Hp * 4
                                + B_pad * D * out_is + B_pad * Sp * 4),
            ),
        )

    try:
        # Resident weights never change block index -> single-buffer them and
        # give the reclaimed VMEM to the batch tile.
        out_v, out_w = build({"pipeline_mode": pl.Buffered(1)})(x, w1, w2)
    except Exception:
        # Portability fallback: same kernel with default (double) buffering.
        out_v, out_w = build({})(x, w1, w2)

    out_v = out_v[:B]
    out_w = out_w[:B, :S]
    return out_v, out_w.reshape(B, S, 1)


def _reference(input_embed, w_key_hidden, w_key_output, hidden_dim):
    B, S, D = input_embed.shape
    x2 = input_embed.reshape(-1, D)
    keys = jax.nn.relu(x2 @ w_key_hidden.T)
    if hidden_dim == 1:
        keys = keys.reshape(B, -1)
    else:
        keys = (keys @ w_key_output.T).reshape(B, -1)
    wk = jax.nn.softmax(keys, axis=1).reshape(B, -1, 1)
    wv = jnp.sum(wk * input_embed, axis=1)
    return wv, wk


if __name__ == "__main__":
    B, S, D, H = 2, 8, 32, 16

    key = jax.random.PRNGKey(0)
    kx, k1, k2, k3, k4 = jax.random.split(key, 5)

    x = jax.random.normal(kx, (B, S, D), dtype=jnp.float32)
    w_key_hidden = jax.random.normal(k1, (H, D), dtype=jnp.float32) * 0.1
    w_key_output = jax.random.normal(k2, (1, H), dtype=jnp.float32) * 0.1

    # 1) f32 path, small batch (single tile).
    out_v, out_w = self_attentive_sum(x, w_key_hidden, w_key_output, hidden_dim=H)
    out_v = jax.block_until_ready(out_v)
    out_w = jax.block_until_ready(out_w)
    ref_v, ref_w = _reference(x, w_key_hidden, w_key_output, hidden_dim=H)
    assert out_v.shape == (B, D) and out_w.shape == (B, S, 1)
    assert jnp.allclose(out_v, ref_v, atol=1e-4, rtol=1e-4)
    assert jnp.allclose(out_w, ref_w, atol=1e-4, rtol=1e-4)

    # 2) hidden_dim == 1 branch (key_output skipped in the PyTorch module).
    w_kh1 = jax.random.normal(k1, (1, D), dtype=jnp.float32) * 0.1
    out_v1, out_w1 = self_attentive_sum(
        x, w_kh1, jnp.ones((1, 1), dtype=jnp.float32), hidden_dim=1)
    jax.block_until_ready(out_v1)
    ref_v1, ref_w1 = _reference(x, w_kh1, jnp.ones((1, 1), jnp.float32), 1)
    assert jnp.allclose(out_v1, ref_v1, atol=1e-4, rtol=1e-4)
    assert jnp.allclose(out_w1, ref_w1, atol=1e-4, rtol=1e-4)

    # 3) S not a multiple of 8: exercises the sequence-pad + mask path.
    x7 = jax.random.normal(k3, (B, 7, D), dtype=jnp.float32)
    out_v7, out_w7 = self_attentive_sum(x7, w_key_hidden, w_key_output, H)
    jax.block_until_ready(out_v7)
    ref_v7, ref_w7 = _reference(x7, w_key_hidden, w_key_output, H)
    assert out_w7.shape == (B, 7, 1)
    assert jnp.allclose(out_v7, ref_v7, atol=1e-4, rtol=1e-4)
    assert jnp.allclose(out_w7, ref_w7, atol=1e-4, rtol=1e-4)

    # 4) B > 8: exercises batch tiling / padding with a multi-step parallel grid.
    x12 = jax.random.normal(k4, (12, S, D), dtype=jnp.float32)
    out_v12, out_w12 = self_attentive_sum(x12, w_key_hidden, w_key_output, H)
    jax.block_until_ready(out_v12)
    ref_v12, ref_w12 = _reference(x12, w_key_hidden, w_key_output, H)
    assert out_v12.shape == (12, D) and out_w12.shape == (12, S, 1)
    assert jnp.allclose(out_v12, ref_v12, atol=1e-4, rtol=1e-4)
    assert jnp.allclose(out_w12, ref_w12, atol=1e-4, rtol=1e-4)

    # 5) bf16 storage path: native-rate bf16 MXU + halved HBM traffic.
    x_bf = x.astype(jnp.bfloat16)
    out_vb, out_wb = self_attentive_sum(x_bf, w_key_hidden, w_key_output, H)
    jax.block_until_ready(out_vb)
    ref_vb, ref_wb = _reference(x_bf.astype(jnp.float32), w_key_hidden,
                                w_key_output, H)
    assert out_wb.dtype == jnp.float32
    assert jnp.allclose(out_vb.astype(jnp.float32), ref_vb, atol=2e-2, rtol=2e-2)
    assert jnp.allclose(out_wb[..., 0], ref_wb[..., 0], atol=2e-2, rtol=2e-2)

    print("KERNEL_OK")
</pallas_src>

<mosaic_0001>
module attributes {stable_mosaic.version = 11 : i64} {
  func.func @kernel(%arg0: i32, %arg1: memref<2x8x32xf32, #tpu.memory_space<vmem>>, %arg2: memref<32x128xf32, #tpu.memory_space<vmem>>, %arg3: memref<1x128xf32, #tpu.memory_space<vmem>>, %arg4: memref<2x32xf32, #tpu.memory_space<vmem>>, %arg5: memref<2x8xf32, #tpu.memory_space<vmem>>) attributes {dimension_semantics = [#tpu.dimension_semantics<parallel>], iteration_bounds = array<i64: 1>, scalar_prefetch = 0 : i64, scratch_operands = 0 : i64, tpu.core_type = #tpu.core_type<tc>, window_params = [{transform_indices = @transform_0, window_bounds = array<i64: 2, 8, 32>}, {pipeline_mode = #tpu.pipeline_mode<synchronous>, transform_indices = @transform_1, window_bounds = array<i64: 32, 128>}, {pipeline_mode = #tpu.pipeline_mode<synchronous>, transform_indices = @transform_2, window_bounds = array<i64: 1, 128>}, {transform_indices = @transform_3, window_bounds = array<i64: 2, 32>}, {transform_indices = @transform_4, window_bounds = array<i64: 2, 8>}]} {
    %c0 = arith.constant 0 : index
    %c0_0 = arith.constant 0 : index
    %c0_1 = arith.constant 0 : index
    %0 = vector.load %arg1[%c0, %c0_0, %c0_1] : memref<2x8x32xf32, #tpu.memory_space<vmem>>, vector<2x8x32xf32>
    %1 = vector.shape_cast %0 : vector<2x8x32xf32> to vector<16x32xf32>
    %c0_2 = arith.constant 0 : index
    %c0_3 = arith.constant 0 : index
    %2 = vector.load %arg2[%c0_2, %c0_3] : memref<32x128xf32, #tpu.memory_space<vmem>>, vector<32x128xf32>
    %cst = arith.constant dense<0.000000e+00> : vector<16x128xf32>
    %3 = tpu.matmul %1, %2, %cst {dimension_numbers = #tpu.dot_dimension_numbers<[1], [0], [0], [1], [0, 0, 1, 1], [], []>} : vector<16x32xf32>, vector<32x128xf32>, vector<16x128xf32> -> vector<16x128xf32>
    %cst_4 = arith.constant 0.000000e+00 : f32
    %4 = vector.broadcast %cst_4 : f32 to vector<16x128xf32>
    %5 = arith.maximumf %3, %4 : vector<16x128xf32>
    %6 = vector.shape_cast %5 : vector<16x128xf32> to vector<2x8x128xf32>
    %c0_5 = arith.constant 0 : index
    %c0_6 = arith.constant 0 : index
    %7 = vector.load %arg3[%c0_5, %c0_6] : memref<1x128xf32, #tpu.memory_space<vmem>>, vector<1x128xf32>
    %8 = vector.shape_cast %7 : vector<1x128xf32> to vector<1x1x128xf32>
    %9 = vector.broadcast %8 : vector<1x1x128xf32> to vector<2x8x128xf32>
    %10 = arith.mulf %6, %9 : vector<2x8x128xf32>
    %cst_7 = arith.constant dense<0.000000e+00> : vector<2x8xf32>
    %11 = vector.multi_reduction <add>, %10, %cst_7 [2] : vector<2x8x128xf32> to vector<2x8xf32>
    %cst_8 = arith.constant dense<0xFF800000> : vector<2xf32>
    %12 = vector.multi_reduction <maximumf>, %11, %cst_8 [1] : vector<2x8xf32> to vector<2xf32>
    %13 = vector.shape_cast %12 : vector<2xf32> to vector<2x1xf32>
    %14 = vector.broadcast %13 : vector<2x1xf32> to vector<2x8xf32>
    %15 = arith.subf %11, %14 : vector<2x8xf32>
    %16 = math.exp %15 : vector<2x8xf32>
    %cst_9 = arith.constant dense<0.000000e+00> : vector<2xf32>
    %17 = vector.multi_reduction <add>, %16, %cst_9 [1] : vector<2x8xf32> to vector<2xf32>
    %18 = vector.shape_cast %17 : vector<2xf32> to vector<2x1xf32>
    %19 = tpu.reciprocal %18 {approx = true} : vector<2x1xf32> -> vector<2x1xf32>
    %20 = arith.mulf %18, %19 : vector<2x1xf32>
    %cst_10 = arith.constant 2.000000e+00 : f32
    %21 = vector.broadcast %cst_10 : f32 to vector<2x1xf32>
    %22 = arith.subf %21, %20 : vector<2x1xf32>
    %23 = arith.mulf %19, %22 : vector<2x1xf32>
    %24 = vector.broadcast %23 : vector<2x1xf32> to vector<2x8xf32>
    %25 = arith.mulf %16, %24 : vector<2x8xf32>
    %c0_11 = arith.constant 0 : index
    %c0_12 = arith.constant 0 : index
    %26 = vector.load %arg5[%c0_11, %c0_12] : memref<2x8xf32, #tpu.memory_space<vmem>>, vector<2x8xf32>
    tpu.vector_store %arg5[%c0_11, %c0_12], %25 {strides = array<i32>} : memref<2x8xf32, #tpu.memory_space<vmem>>, vector<2x8xf32>,
    %27 = vector.shape_cast %25 : vector<2x8xf32> to vector<2x8x1xf32>
    %28 = vector.broadcast %27 : vector<2x8x1xf32> to vector<2x8x32xf32>
    %29 = arith.mulf %28, %0 : vector<2x8x32xf32>
    %cst_13 = arith.constant dense<0.000000e+00> : vector<2x32xf32>
    %30 = vector.multi_reduction <add>, %29, %cst_13 [1] : vector<2x8x32xf32> to vector<2x32xf32>
    %c0_14 = arith.constant 0 : index
    %c0_15 = arith.constant 0 : index
    %31 = vector.load %arg4[%c0_14, %c0_15] : memref<2x32xf32, #tpu.memory_space<vmem>>, vector<2x32xf32>
    tpu.vector_store %arg4[%c0_14, %c0_15], %30 {strides = array<i32>} : memref<2x32xf32, #tpu.memory_space<vmem>>, vector<2x32xf32>,
    return
  }
  func.func @transform_0(%arg0: i32) -> (i32, i32, i32) {
    %c0_i32 = arith.constant 0 : i32
    %c0_i32_0 = arith.constant 0 : i32
    %c0_i32_1 = arith.constant 0 : i32
    return %arg0, %c0_i32, %c0_i32_0 : i32, i32, i32
  }
  func.func @transform_1(%arg0: i32) -> (i32, i32) {
    %c0_i32 = arith.constant 0 : i32
    %c0_i32_0 = arith.constant 0 : i32
    %c0_i32_1 = arith.constant 0 : i32
    return %c0_i32, %c0_i32_0 : i32, i32
  }
  func.func @transform_2(%arg0: i32) -> (i32, i32) {
    %c0_i32 = arith.constant 0 : i32
    %c0_i32_0 = arith.constant 0 : i32
    %c0_i32_1 = arith.constant 0 : i32
    return %c0_i32, %c0_i32_0 : i32, i32
  }
  func.func @transform_3(%arg0: i32) -> (i32, i32) {
    %c0_i32 = arith.constant 0 : i32
    %c0_i32_0 = arith.constant 0 : i32
    return %arg0, %c0_i32 : i32, i32
  }
  func.func @transform_4(%arg0: i32) -> (i32, i32) {
    %c0_i32 = arith.constant 0 : i32
    %c0_i32_0 = arith.constant 0 : i32
    return %arg0, %c0_i32 : i32, i32
  }
}

module attributes {stable_mosaic.version = 11 : i64} {
  func.func @kernel(%arg0: i32, %arg1: memref<2x8x32xf32, #tpu.memory_space<vmem>>, %arg2: memref<32x128xf32, #tpu.memory_space<vmem>>, %arg3: memref<1x128xf32, #tpu.memory_space<vmem>>, %arg4: memref<2x32xf32, #tpu.memory_space<vmem>>, %arg5: memref<2x8xf32, #tpu.memory_space<vmem>>) attributes {dimension_semantics = [#tpu.dimension_semantics<parallel>], iteration_bounds = array<i64: 1>, scalar_prefetch = 0 : i64, scratch_operands = 0 : i64, tpu.core_type = #tpu.core_type<tc>, window_params = [{transform_indices = @transform_0, window_bounds = array<i64: 2, 8, 32>}, {pipeline_mode = #tpu.pipeline_mode<synchronous>, transform_indices = @transform_1, window_bounds = array<i64: 32, 128>}, {pipeline_mode = #tpu.pipeline_mode<synchronous>, transform_indices = @transform_2, window_bounds = array<i64: 1, 128>}, {transform_indices = @transform_3, window_bounds = array<i64: 2, 32>}, {transform_indices = @transform_4, window_bounds = array<i64: 2, 8>}]} {
    %c0 = arith.constant 0 : index
    %c0_0 = arith.constant 0 : index
    %c0_1 = arith.constant 0 : index
    %0 = vector.load %arg1[%c0, %c0_0, %c0_1] : memref<2x8x32xf32, #tpu.memory_space<vmem>>, vector<2x8x32xf32>
    %1 = vector.shape_cast %0 : vector<2x8x32xf32> to vector<16x32xf32>
    %c0_2 = arith.constant 0 : index
    %c0_3 = arith.constant 0 : index
    %2 = vector.load %arg2[%c0_2, %c0_3] : memref<32x128xf32, #tpu.memory_space<vmem>>, vector<32x128xf32>
    %cst = arith.constant dense<0.000000e+00> : vector<16x128xf32>
    %3 = tpu.matmul %1, %2, %cst {dimension_numbers = #tpu.dot_dimension_numbers<[1], [0], [0], [1], [0, 0, 1, 1], [], []>} : vector<16x32xf32>, vector<32x128xf32>, vector<16x128xf32> -> vector<16x128xf32>
    %cst_4 = arith.constant 0.000000e+00 : f32
    %4 = vector.broadcast %cst_4 : f32 to vector<16x128xf32>
    %5 = arith.maximumf %3, %4 : vector<16x128xf32>
    %6 = vector.shape_cast %5 : vector<16x128xf32> to vector<2x8x128xf32>
    %c0_5 = arith.constant 0 : index
    %c0_6 = arith.constant 0 : index
    %7 = vector.load %arg3[%c0_5, %c0_6] : memref<1x128xf32, #tpu.memory_space<vmem>>, vector<1x128xf32>
    %8 = vector.shape_cast %7 : vector<1x128xf32> to vector<1x1x128xf32>
    %9 = vector.broadcast %8 : vector<1x1x128xf32> to vector<2x8x128xf32>
    %10 = arith.mulf %6, %9 : vector<2x8x128xf32>
    %cst_7 = arith.constant dense<0.000000e+00> : vector<2x8xf32>
    %11 = vector.multi_reduction <add>, %10, %cst_7 [2] : vector<2x8x128xf32> to vector<2x8xf32>
    %cst_8 = arith.constant dense<0xFF800000> : vector<2xf32>
    %12 = vector.multi_reduction <maximumf>, %11, %cst_8 [1] : vector<2x8xf32> to vector<2xf32>
    %13 = vector.shape_cast %12 : vector<2xf32> to vector<2x1xf32>
    %14 = vector.broadcast %13 : vector<2x1xf32> to vector<2x8xf32>
    %15 = arith.subf %11, %14 : vector<2x8xf32>
    %16 = math.exp %15 : vector<2x8xf32>
    %cst_9 = arith.constant dense<0.000000e+00> : vector<2xf32>
    %17 = vector.multi_reduction <add>, %16, %cst_9 [1] : vector<2x8xf32> to vector<2xf32>
    %18 = vector.shape_cast %17 : vector<2xf32> to vector<2x1xf32>
    %19 = tpu.reciprocal %18 {approx = true} : vector<2x1xf32> -> vector<2x1xf32>
    %20 = arith.mulf %18, %19 : vector<2x1xf32>
    %cst_10 = arith.constant 2.000000e+00 : f32
    %21 = vector.broadcast %cst_10 : f32 to vector<2x1xf32>
    %22 = arith.subf %21, %20 : vector<2x1xf32>
    %23 = arith.mulf %19, %22 : vector<2x1xf32>
    %24 = vector.broadcast %23 : vector<2x1xf32> to vector<2x8xf32>
    %25 = arith.mulf %16, %24 : vector<2x8xf32>
    %c0_11 = arith.constant 0 : index
    %c0_12 = arith.constant 0 : index
    %26 = vector.load %arg5[%c0_11, %c0_12] : memref<2x8xf32, #tpu.memory_space<vmem>>, vector<2x8xf32>
    tpu.vector_store %arg5[%c0_11, %c0_12], %25 {strides = array<i32>} : memref<2x8xf32, #tpu.memory_space<vmem>>, vector<2x8xf32>,
    %27 = vector.shape_cast %25 : vector<2x8xf32> to vector<2x8x1xf32>
    %28 = vector.broadcast %27 : vector<2x8x1xf32> to vector<2x8x32xf32>
    %29 = arith.mulf %28, %0 : vector<2x8x32xf32>
    %cst_13 = arith.constant dense<0.000000e+00> : vector<2x32xf32>
    %30 = vector.multi_reduction <add>, %29, %cst_13 [1] : vector<2x8x32xf32> to vector<2x32xf32>
    %c0_14 = arith.constant 0 : index
    %c0_15 = arith.constant 0 : index
    %31 = vector.load %arg4[%c0_14, %c0_15] : memref<2x32xf32, #tpu.memory_space<vmem>>, vector<2x32xf32>
    tpu.vector_store %arg4[%c0_14, %c0_15], %30 {strides = array<i32>} : memref<2x32xf32, #tpu.memory_space<vmem>>, vector<2x32xf32>,
    return
  }
  func.func @transform_0(%arg0: i32) -> (i32, i32, i32) {
    %c0_i32 = arith.constant 0 : i32
    %c0_i32_0 = arith.constant 0 : i32
    %c0_i32_1 = arith.constant 0 : i32
    return %arg0, %c0_i32, %c0_i32_0 : i32, i32, i32
  }
  func.func @transform_1(%arg0: i32) -> (i32, i32) {
    %c0_i32 = arith.constant 0 : i32
    %c0_i32_0 = arith.constant 0 : i32
    %c0_i32_1 = arith.constant 0 : i32
    return %c0_i32, %c0_i32_0 : i32, i32
  }
  func.func @transform_2(%arg0: i32) -> (i32, i32) {
    %c0_i32 = arith.constant 0 : i32
    %c0_i32_0 = arith.constant 0 : i32
    %c0_i32_1 = arith.constant 0 : i32
    return %c0_i32, %c0_i32_0 : i32, i32
  }
  func.func @transform_3(%arg0: i32) -> (i32, i32) {
    %c0_i32 = arith.constant 0 : i32
    %c0_i32_0 = arith.constant 0 : i32
    return %arg0, %c0_i32 : i32, i32
  }
  func.func @transform_4(%arg0: i32) -> (i32, i32) {
    %c0_i32 = arith.constant 0 : i32
    %c0_i32_0 = arith.constant 0 : i32
    return %arg0, %c0_i32 : i32, i32
  }
}

</mosaic_0001>

<bundles_post_ra>
// kernel: tpu_custom_call.1
= control target key start
LH: loop header
LB: loop body
LE: loop exit
PB: predicated region body
PF: predicated region fallthrough
CT: control target
= control target key end

     0   :  { %10 = vsyncpa [#allocation3], 0  ;;  %s412_s0 = inlined_call_operand.hbm [shape: f32[2,8,32], index: 0, kind: input, shape index: {}]   ;;  %s413_s1 = inlined_call_operand.hbm [shape: f32[32,128], index: 1, kind: input, shape index: {}]   ;;  %s414_s2 = inlined_call_operand.vmem [shape: f32[1,128], index: 2, kind: input, shape index: {}]   ;;  %s415_s3 = inlined_call_operand.hbm [shape: f32[2,32], index: 3, kind: output, shape index: {0}]   ;;  %s416_s4 = inlined_call_operand.hbm [shape: f32[2,8], index: 4, kind: output, shape index: {1}]  }
   0x1   :  { %11 = vsyncpa [#allocation6], 0 }
   0x2   :  { %12 = vsyncpa [#allocation4], 0 }
   0x3   :  { %13 = vsyncpa [#allocation9], 0  ;;  %s18_s17 = sshll.u32 %s412_s0, 4  ;;  %s346_s18 = smov [#allocation2]   ;;  %s19_s17 = int_to_ptr.hbm [resolvable:$true] %s18_s17 }
   0x4   :  { %s20_s19 = sshll.u32 %s346_s18, 4  ;;  %s31_s22 = sshll.u32 %s413_s1, 4  ;;  %s21_s19 = int_to_ptr.vmem [resolvable:$true] %s20_s19  ;;  %s32_s22 = int_to_ptr.hbm [resolvable:$true] %s31_s22 }
   0x5   :  { %s347_s23 = smov 128   ;;  %s348_s24 = smov 8  }
   0x6   :  { %26 = dma.hbm_to_vmem [thread:$0]  %s19_s17, 256, %s21_s19, [#allocation3], %s347_s23, %s347_s23, %s348_s24  }
   0x7   :  { %s349_s25 = smov [#allocation5]  }
   0x8   :  { %s33_s26 = sshll.u32 %s349_s25, 4  ;;  %s34_s26 = int_to_ptr.vmem [resolvable:$true] %s33_s26 }
   0x9   :  { %39 = dma.hbm_to_vmem [thread:$0]  %s32_s22, 512, %s34_s26, [#allocation6], %s347_s23, %s347_s23, %s348_s24  }
   0xa   :  { %338 = dma.done.wait [#allocation3], 256  }
   0xb   :  { %339 = vsyncadd [#allocation3], 4294967040 }
   0xc   :  { %340 = dma.done.wait [#allocation6], 512  }
   0xd   :  { %341 = vsyncadd [#allocation6], 4294966784  ;;  %v55_v0 = vld [vmem:[#allocation5 + $0x18] sm:$0xff]  ;;  %v54_v1 = vld [vmem:[#allocation5 + $0x10] sm:$0xff]  ;;  %vm56_vm0 = vcmask 261120   ;;  %v100_v14 = vlaneseq  ;;  %vm104_vm1 = vcmask 1041409  }
   0xe   :  { %75 = vmatpush.msra.mxu0 %v55_v0  ;;  %221 = vmatpush.msra.mxu1 %v55_v0  ;;  %v53_v2 = vld [vmem:[#allocation5 + $0x8] sm:$0xff]  ;;  %v52_v3 = vld [vmem:[#allocation5] sm:$0xff]  ;;  %v384_v4 = vld [vmem:[#allocation2] sm:$0xff]  ;;  %vm107_vm2 = vcmask 58368   ;;  %v350_v21 = vmov 0   ;;  %s203_s30 = sshll.u32 %s416_s4, 4  ;;  %s204_s30 = int_to_ptr.hbm [resolvable:$true] %s203_s30 }
   0xf   :  { %v386_v5 = vld [vmem:[#allocation2 + $0x8] sm:$0xff]  ;;  %v235_v6 = vld [vmem:[%s414_s2] ss:$0 sm:$0xff]  ;;  %v101_v15 = vand.u32 127, %v100_v14  ;;  %233 = vset.pattern.permute.xlu2 %v350_v21  ;;  %232 = vset.pattern.permute.xlu1 %v350_v21  ;;  %s351_s2 = smov [#allocation8]   ;;  %s352_s4 = smov [#allocation7]  }
  0x10   :  { %76 = vmatpush.msra.mxu0 %v54_v1  ;;  %222 = vmatpush.msra.mxu1 %v54_v1  ;;  %s201_s27 = sshll.u32 %s351_s2, 4  ;;  %s190_s5 = sshll.u32 %s352_s4, 4  ;;  %vm183_vm3 = vcmask 254976   ;;  %s202_s27 = int_to_ptr.vmem [resolvable:$true] %s201_s27  ;;  %s191_s5 = int_to_ptr.vmem [resolvable:$true] %s190_s5 }
  0x11   :  { %234 = vset.pattern.permute.xlu0 %v350_v21  ;;  %s192_s8 = sshll.u32 %s415_s3, 4  ;;  %s193_s8 = int_to_ptr.hbm [resolvable:$true] %s192_s8 }
  0x12   :  { %77 = vmatpush.msra.mxu0 %v53_v2  ;;  %223 = vmatpush.msra.mxu1 %v53_v2 }
  0x14   :  { %78 = vmatpush.msra.mxu0 %v52_v3  ;;  %224 = vmatpush.msra.mxu1 %v52_v3 }
  0x15   :  { %219 = vmatmul.msk.f32.vlgmr.msra.gmra.mxu0 %vm56_vm0, %v384_v4  ;;  %220 = vmatmul.msk.f32.vlgmr.msra.gmra.mxu1 %vm56_vm0, %v386_v5 }
  0x92   :  { %v80_v7 = vpop.f32.mrf.mxu0  ;;  %v83_v9 = vpop.f32.mrf.mxu1 }
  0x93   :  { %v86_v8 = vmax.f32 %v80_v7, 0.0  ;;  %v87_v11 = vmax.f32 %v83_v9, 0.0 }
  0x95   :  { %v92_v10 = vmul.f32 %v235_v6, %v86_v8  ;;  %v93_v12 = vmul.f32 %v235_v6, %v87_v11 }
  0x97   :  { %94 = vadd.xlane.f32.xlu0 %v92_v10 }
  0x9f   :  { %96 = vadd.xlane.f32.xlu0 %v93_v12 }
 0x10a   :  { %v95_v13 = vpop.xlane.xlu0 %94 }
 0x10b   :  { %v102_v17 = vperm.slane %v95_v13, %v101_v15 }
 0x112   :  { %v97_v16 = vpop.xlane.xlu0 %96 }
 0x113   :  { %v103_v18 = vperm.slane %v97_v16, %v101_v15 }
 0x115   :  { %v105_v19 = vsel %vm104_vm1, %v103_v18, %v102_v17 }
 0x116   :  { %v108_v20 = vsel %vm107_vm2, %v105_v19, -inf }
 0x117   :  { %109 = vmax.xlane.f32.xlu1 %v108_v20 }
 0x18a   :  { %v110_v22 = vpop.xlane.xlu1 %109 }
 0x18b   :  { %v112_v23 = vperm.slane %v110_v22, 0  ;;  %v113_v24 = vperm.slane %v110_v22, 1 }
 0x18d   :  { %v116_v25 = vsub.f32 %v95_v13, %v112_v23  ;;  %v117_v26 = vsub.f32 %v97_v16, %v113_v24 }
 0x18f   :  { %v118_v27 = vmul.f32 1.442695, %v116_v25  ;;  %v120_v28 = vmul.f32 1.442695, %v117_v26 }
 0x191   :  { %236 = vpow2.f32 %v118_v27 }
 0x192   :  { %238 = vpow2.f32 %v120_v28 }
 0x197   :  { %v237_v29 = vpop.eup %236 }
 0x198   :  { %v239_v30 = vpop.eup %238  ;;  %125 = vperm.xlu1 %232, %v237_v29  }
 0x199   :  { %128 = vperm.xlu2 %233, %v239_v30  }
 0x1f3   :  { %v129_v31 = vpop.permute.xlu2 %128 }
 0x1f4   :  { %v131_v33 = vperm.slane %v129_v31, %v101_v15 }
 0x20a   :  { %v126_v32 = vpop.permute.xlu1 %125 }
 0x20b   :  { %v130_v34 = vperm.slane %v126_v32, %v101_v15 }
 0x20d   :  { %v132_v35 = vsel %vm104_vm1, %v131_v33, %v130_v34 }
 0x20e   :  { %v134_v36 = vsel %vm107_vm2, %v132_v35, 0.0 }
 0x20f   :  { %135 = vadd.xlane.f32.xlu2 %v134_v36 }
 0x282   :  { %v136_v37 = vpop.xlane.xlu2 %135 }
 0x283   :  { %240 = vrcp.f32 %v136_v37 }
 0x289   :  { %v241_v38 = vpop.eup %240 }
 0x28a   :  { %v138_v39 = vmul.f32 %v241_v38, %v136_v37 }
 0x28c   :  { %v139_v40 = vsub.f32 2.0, %v138_v39 }
 0x28e   :  { %v140_v41 = vmul.f32 %v241_v38, %v139_v40 }
 0x290   :  { %v142_v42 = vperm.slane %v140_v41, 0  ;;  %v143_v43 = vperm.slane %v140_v41, 1 }
 0x292   :  { %v147_v44 = vmul.f32 %v239_v30, %v143_v43  ;;  %v146_v45 = vmul.f32 %v237_v29, %v142_v42 }
 0x294   :  { %154 = vperm.xlu1 %232, %v147_v44   ;;  %151 = vperm.xlu0 %234, %v146_v45  }
 0x306   :  { %v155_v46 = vpop.permute.xlu1 %154  ;;  %v152_v47 = vpop.permute.xlu0 %151 }
 0x307   :  { %v157_v48 = vperm.slane %v155_v46, %v101_v15  ;;  %v164_v49 = vmul.f32 %v155_v46, %v386_v5  ;;  %v156_v50 = vperm.slane %v152_v47, %v101_v15  ;;  %v163_v51 = vmul.f32 %v152_v47, %v384_v4 }
 0x309   :  { %v172_v52 = vsel %vm56_vm0, %v164_v49, 0.0  ;;  %v158_v53 = vsel %vm104_vm1, %v157_v48, %v156_v50  ;;  %v165_v54 = vsel %vm56_vm0, %v163_v51, 0.0 }
 0x30a   :  { %v173_v55 = vrot.slane %v172_v52, 4  ;;  %v166_v56 = vrot.slane %v165_v54, 4  ;;  %160 = vst.msk [vmem:[#allocation8] sm:$0x3] %vm107_vm2, %v158_v53 }
 0x30b   :  { %206 = dma.vmem_to_hbm [thread:$0]  %s202_s27, 32, %s204_s30, [#allocation9]  }
 0x30c   :  { %v174_v57 = vadd.f32 %v173_v55, %v172_v52  ;;  %v167_v58 = vadd.f32 %v166_v56, %v165_v54 }
 0x30e   :  { %v175_v59 = vrot.slane %v174_v57, 2  ;;  %v168_v60 = vrot.slane %v167_v58, 2 }
 0x310   :  { %v176_v61 = vadd.f32 %v175_v59, %v174_v57  ;;  %v169_v62 = vadd.f32 %v168_v60, %v167_v58 }
 0x312   :  { %v177_v63 = vrot.slane %v176_v61, 1  ;;  %v170_v0 = vrot.slane %v169_v62, 1 }
 0x314   :  { %v178_v1 = vadd.f32 %v177_v63, %v176_v61  ;;  %v171_v2 = vadd.f32 %v170_v0, %v169_v62 }
 0x316   :  { %v181_v3 = vsel %vm104_vm1, %v178_v1, %v171_v2 }
 0x317   :  { %184 = vst.msk [vmem:[#allocation7] sm:$0x3] %vm183_vm3, %v181_v3 }
 0x318   :  { %195 = dma.vmem_to_hbm [thread:$0]  %s191_s5, 32, %s193_s8, [#allocation4]  }
 0x319   :  { %342 = dma.done.wait [#allocation4], 32  }
 0x31a   :  { %343 = vsyncadd [#allocation4], 4294967264 }
 0x31b   :  { %344 = dma.done.wait [#allocation9], 32  }
 0x31c   :  { %345 = vsyncadd [#allocation9], 4294967264 }
 0x31d   :  { %215 = vsyncpa [#allocation3], 1 }
 0x31e   :  { %216 = vsyncpa [#allocation6], 1 }
 0x31f   :  { %217 = vsyncpa [#allocation4], 1 }
 0x320   :  { %218 = vsyncpa [#allocation9], 1 }

// kernel: tpu_custom_call.1
= control target key start
LH: loop header
LB: loop body
LE: loop exit
PB: predicated region body
PF: predicated region fallthrough
CT: control target
= control target key end

     0   :  { %10 = vsyncpa [#allocation3], 0  ;;  %s412_s0 = inlined_call_operand.hbm [shape: f32[2,8,32], index: 0, kind: input, shape index: {}]   ;;  %s413_s1 = inlined_call_operand.hbm [shape: f32[32,128], index: 1, kind: input, shape index: {}]   ;;  %s414_s2 = inlined_call_operand.vmem [shape: f32[1,128], index: 2, kind: input, shape index: {}]   ;;  %s415_s3 = inlined_call_operand.hbm [shape: f32[2,32], index: 3, kind: output, shape index: {0}]   ;;  %s416_s4 = inlined_call_operand.hbm [shape: f32[2,8], index: 4, kind: output, shape index: {1}]  }
   0x1   :  { %11 = vsyncpa [#allocation6], 0 }
   0x2   :  { %12 = vsyncpa [#allocation4], 0 }
   0x3   :  { %13 = vsyncpa [#allocation9], 0  ;;  %s18_s17 = sshll.u32 %s412_s0, 4  ;;  %s346_s18 = smov [#allocation2]   ;;  %s19_s17 = int_to_ptr.hbm [resolvable:$true] %s18_s17 }
   0x4   :  { %s20_s19 = sshll.u32 %s346_s18, 4  ;;  %s31_s22 = sshll.u32 %s413_s1, 4  ;;  %s21_s19 = int_to_ptr.vmem [resolvable:$true] %s20_s19  ;;  %s32_s22 = int_to_ptr.hbm [resolvable:$true] %s31_s22 }
   0x5   :  { %s347_s23 = smov 128   ;;  %s348_s24 = smov 8  }
   0x6   :  { %26 = dma.hbm_to_vmem [thread:$0]  %s19_s17, 256, %s21_s19, [#allocation3], %s347_s23, %s347_s23, %s348_s24  }
   0x7   :  { %s349_s25 = smov [#allocation5]  }
   0x8   :  { %s33_s26 = sshll.u32 %s349_s25, 4  ;;  %s34_s26 = int_to_ptr.vmem [resolvable:$true] %s33_s26 }
   0x9   :  { %39 = dma.hbm_to_vmem [thread:$0]  %s32_s22, 512, %s34_s26, [#allocation6], %s347_s23, %s347_s23, %s348_s24  }
   0xa   :  { %338 = dma.done.wait [#allocation3], 256  }
   0xb   :  { %339 = vsyncadd [#allocation3], 4294967040 }
   0xc   :  { %340 = dma.done.wait [#allocation6], 512  }
   0xd   :  { %341 = vsyncadd [#allocation6], 4294966784  ;;  %v55_v0 = vld [vmem:[#allocation5 + $0x18] sm:$0xff]  ;;  %v54_v1 = vld [vmem:[#allocation5 + $0x10] sm:$0xff]  ;;  %vm56_vm0 = vcmask 261120   ;;  %v100_v14 = vlaneseq  ;;  %vm104_vm1 = vcmask 1041409  }
   0xe   :  { %75 = vmatpush.msra.mxu0 %v55_v0  ;;  %221 = vmatpush.msra.mxu1 %v55_v0  ;;  %v53_v2 = vld [vmem:[#allocation5 + $0x8] sm:$0xff]  ;;  %v52_v3 = vld [vmem:[#allocation5] sm:$0xff]  ;;  %v384_v4 = vld [vmem:[#allocation2] sm:$0xff]  ;;  %vm107_vm2 = vcmask 58368   ;;  %v350_v21 = vmov 0   ;;  %s203_s30 = sshll.u32 %s416_s4, 4  ;;  %s204_s30 = int_to_ptr.hbm [resolvable:$true] %s203_s30 }
   0xf   :  { %v386_v5 = vld [vmem:[#allocation2 + $0x8] sm:$0xff]  ;;  %v235_v6 = vld [vmem:[%s414_s2] ss:$0 sm:$0xff]  ;;  %v101_v15 = vand.u32 127, %v100_v14  ;;  %233 = vset.pattern.permute.xlu2 %v350_v21  ;;  %232 = vset.pattern.permute.xlu1 %v350_v21  ;;  %s351_s2 = smov [#allocation8]   ;;  %s352_s4 = smov [#allocation7]  }
  0x10   :  { %76 = vmatpush.msra.mxu0 %v54_v1  ;;  %222 = vmatpush.msra.mxu1 %v54_v1  ;;  %s201_s27 = sshll.u32 %s351_s2, 4  ;;  %s190_s5 = sshll.u32 %s352_s4, 4  ;;  %vm183_vm3 = vcmask 254976   ;;  %s202_s27 = int_to_ptr.vmem [resolvable:$true] %s201_s27  ;;  %s191_s5 = int_to_ptr.vmem [resolvable:$true] %s190_s5 }
  0x11   :  { %234 = vset.pattern.permute.xlu0 %v350_v21  ;;  %s192_s8 = sshll.u32 %s415_s3, 4  ;;  %s193_s8 = int_to_ptr.hbm [resolvable:$true] %s192_s8 }
  0x12   :  { %77 = vmatpush.msra.mxu0 %v53_v2  ;;  %223 = vmatpush.msra.mxu1 %v53_v2 }
  0x14   :  { %78 = vmatpush.msra.mxu0 %v52_v3  ;;  %224 = vmatpush.msra.mxu1 %v52_v3 }
  0x15   :  { %219 = vmatmul.msk.f32.vlgmr.msra.gmra.mxu0 %vm56_vm0, %v384_v4  ;;  %220 = vmatmul.msk.f32.vlgmr.msra.gmra.mxu1 %vm56_vm0, %v386_v5 }
  0x92   :  { %v80_v7 = vpop.f32.mrf.mxu0  ;;  %v83_v9 = vpop.f32.mrf.mxu1 }
  0x93   :  { %v86_v8 = vmax.f32 %v80_v7, 0.0  ;;  %v87_v11 = vmax.f32 %v83_v9, 0.0 }
  0x95   :  { %v92_v10 = vmul.f32 %v235_v6, %v86_v8  ;;  %v93_v12 = vmul.f32 %v235_v6, %v87_v11 }
  0x97   :  { %94 = vadd.xlane.f32.xlu0 %v92_v10 }
  0x9f   :  { %96 = vadd.xlane.f32.xlu0 %v93_v12 }
 0x10a   :  { %v95_v13 = vpop.xlane.xlu0 %94 }
 0x10b   :  { %v102_v17 = vperm.slane %v95_v13, %v101_v15 }
 0x112   :  { %v97_v16 = vpop.xlane.xlu0 %96 }
 0x113   :  { %v103_v18 = vperm.slane %v97_v16, %v101_v15 }
 0x115   :  { %v105_v19 = vsel %vm104_vm1, %v103_v18, %v102_v17 }
 0x116   :  { %v108_v20 = vsel %vm107_vm2, %v105_v19, -inf }
 0x117   :  { %109 = vmax.xlane.f32.xlu1 %v108_v20 }
 0x18a   :  { %v110_v22 = vpop.xlane.xlu1 %109 }
 0x18b   :  { %v112_v23 = vperm.slane %v110_v22, 0  ;;  %v113_v24 = vperm.slane %v110_v22, 1 }
 0x18d   :  { %v116_v25 = vsub.f32 %v95_v13, %v112_v23  ;;  %v117_v26 = vsub.f32 %v97_v16, %v113_v24 }
 0x18f   :  { %v118_v27 = vmul.f32 1.442695, %v116_v25  ;;  %v120_v28 = vmul.f32 1.442695, %v117_v26 }
 0x191   :  { %236 = vpow2.f32 %v118_v27 }
 0x192   :  { %238 = vpow2.f32 %v120_v28 }
 0x197   :  { %v237_v29 = vpop.eup %236 }
 0x198   :  { %v239_v30 = vpop.eup %238  ;;  %125 = vperm.xlu1 %232, %v237_v29  }
 0x199   :  { %128 = vperm.xlu2 %233, %v239_v30  }
 0x1f3   :  { %v129_v31 = vpop.permute.xlu2 %128 }
 0x1f4   :  { %v131_v33 = vperm.slane %v129_v31, %v101_v15 }
 0x20a   :  { %v126_v32 = vpop.permute.xlu1 %125 }
 0x20b   :  { %v130_v34 = vperm.slane %v126_v32, %v101_v15 }
 0x20d   :  { %v132_v35 = vsel %vm104_vm1, %v131_v33, %v130_v34 }
 0x20e   :  { %v134_v36 = vsel %vm107_vm2, %v132_v35, 0.0 }
 0x20f   :  { %135 = vadd.xlane.f32.xlu2 %v134_v36 }
 0x282   :  { %v136_v37 = vpop.xlane.xlu2 %135 }
 0x283   :  { %240 = vrcp.f32 %v136_v37 }
 0x289   :  { %v241_v38 = vpop.eup %240 }
 0x28a   :  { %v138_v39 = vmul.f32 %v241_v38, %v136_v37 }
 0x28c   :  { %v139_v40 = vsub.f32 2.0, %v138_v39 }
 0x28e   :  { %v140_v41 = vmul.f32 %v241_v38, %v139_v40 }
 0x290   :  { %v142_v42 = vperm.slane %v140_v41, 0  ;;  %v143_v43 = vperm.slane %v140_v41, 1 }
 0x292   :  { %v147_v44 = vmul.f32 %v239_v30, %v143_v43  ;;  %v146_v45 = vmul.f32 %v237_v29, %v142_v42 }
 0x294   :  { %154 = vperm.xlu1 %232, %v147_v44   ;;  %151 = vperm.xlu0 %234, %v146_v45  }
 0x306   :  { %v155_v46 = vpop.permute.xlu1 %154  ;;  %v152_v47 = vpop.permute.xlu0 %151 }
 0x307   :  { %v157_v48 = vperm.slane %v155_v46, %v101_v15  ;;  %v164_v49 = vmul.f32 %v155_v46, %v386_v5  ;;  %v156_v50 = vperm.slane %v152_v47, %v101_v15  ;;  %v163_v51 = vmul.f32 %v152_v47, %v384_v4 }
 0x309   :  { %v172_v52 = vsel %vm56_vm0, %v164_v49, 0.0  ;;  %v158_v53 = vsel %vm104_vm1, %v157_v48, %v156_v50  ;;  %v165_v54 = vsel %vm56_vm0, %v163_v51, 0.0 }
 0x30a   :  { %v173_v55 = vrot.slane %v172_v52, 4  ;;  %v166_v56 = vrot.slane %v165_v54, 4  ;;  %160 = vst.msk [vmem:[#allocation8] sm:$0x3] %vm107_vm2, %v158_v53 }
 0x30b   :  { %206 = dma.vmem_to_hbm [thread:$0]  %s202_s27, 32, %s204_s30, [#allocation9]  }
 0x30c   :  { %v174_v57 = vadd.f32 %v173_v55, %v172_v52  ;;  %v167_v58 = vadd.f32 %v166_v56, %v165_v54 }
 0x30e   :  { %v175_v59 = vrot.slane %v174_v57, 2  ;;  %v168_v60 = vrot.slane %v167_v58, 2 }
 0x310   :  { %v176_v61 = vadd.f32 %v175_v59, %v174_v57  ;;  %v169_v62 = vadd.f32 %v168_v60, %v167_v58 }
 0x312   :  { %v177_v63 = vrot.slane %v176_v61, 1  ;;  %v170_v0 = vrot.slane %v169_v62, 1 }
 0x314   :  { %v178_v1 = vadd.f32 %v177_v63, %v176_v61  ;;  %v171_v2 = vadd.f32 %v170_v0, %v169_v62 }
 0x316   :  { %v181_v3 = vsel %vm104_vm1, %v178_v1, %v171_v2 }
 0x317   :  { %184 = vst.msk [vmem:[#allocation7] sm:$0x3] %vm183_vm3, %v181_v3 }
 0x318   :  { %195 = dma.vmem_to_hbm [thread:$0]  %s191_s5, 32, %s193_s8, [#allocation4]  }
 0x319   :  { %342 = dma.done.wait [#allocation4], 32  }
 0x31a   :  { %343 = vsyncadd [#allocation4], 4294967264 }
 0x31b   :  { %344 = dma.done.wait [#allocation9], 32  }
 0x31c   :  { %345 = vsyncadd [#allocation9], 4294967264 }
 0x31d   :  { %215 = vsyncpa [#allocation3], 1 }
 0x31e   :  { %216 = vsyncpa [#allocation6], 1 }
 0x31f   :  { %217 = vsyncpa [#allocation4], 1 }
 0x320   :  { %218 = vsyncpa [#allocation9], 1 }

</bundles_post_ra>
